<compile_context>
chip_gen: v6e
topology: v6e:2x2x1
jax: 0.10.0
libtpu: 0.0.40
codegen_flags: <defaults>
</compile_context>

<pallas_src>
import jax
import jax.numpy as jnp
from jax.experimental import pallas as pl
from jax.experimental.pallas import tpu as pltpu

IN_SIZE = 128     # Encoder.in_size
INTER1 = 96       # Encoder.inter1_size
OUT_SIZE = 64     # Encoder.out_size
OUT_PAD = 128     # lane-dense (full 128-lane) output store width


def _encoder_kernel(x_ref, w1_ref, b1_ref, w2_ref, b2_ref, o_ref):
    # x_ref:  (tm, 128)
    # w1_ref: (128, 96)    b1_ref: (1, 96)
    # w2_ref: (96, 128)    b2_ref: (1, 128)   (cols 64..127 are zero padding)
    # o_ref:  (tm, 128)
    x = x_ref[...].astype(jnp.float32)   # storage dtype may be bf16; math in f32
    h = jnp.dot(x, w1_ref[...], preferred_element_type=jnp.float32) + b1_ref[...]
    h = jax.nn.sigmoid(h)                               # F.sigmoid(L1(x))
    y = jnp.dot(h, w2_ref[...], preferred_element_type=jnp.float32) + b2_ref[...]
    o_ref[...] = jax.nn.sigmoid(y).astype(o_ref.dtype)  # F.sigmoid(L2(h))


def encoder_forward(x, w1, b1, w2, b2, *, tm=512):
    """x: any shape with total size divisible by IN_SIZE (mirrors reshape(-1, 128)).
       w1: (IN_SIZE, INTER1)  (PyTorch weight pre-transposed), b1: (INTER1,)
       w2: (INTER1, OUT_SIZE),                                 b2: (OUT_SIZE,)
    Returns (m, OUT_SIZE) where m = x.size // IN_SIZE.
    """
    x2 = x.reshape(-1, IN_SIZE)
    m = x2.shape[0]

    # Effective row tile: big (amortizes per-step overhead) but no larger than
    # the sublane-rounded row count.  Ragged m is handled by zero-padding.
    m8 = ((m + 7) // 8) * 8
    tm_eff = min(tm, m8)
    grid_m = pl.cdiv(m, tm_eff)
    m_pad = grid_m * tm_eff
    if m_pad != m:
        x2 = jnp.pad(x2, ((0, m_pad - m), (0, 0)))

    b1r = b1.reshape(1, INTER1)
    # Pad the second layer to 128 output columns -> unmasked full-lane stores.
    w2p = jnp.pad(w2, ((0, 0), (0, OUT_PAD - OUT_SIZE)))
    b2p = jnp.pad(b2, (0, OUT_PAD - OUT_SIZE)).reshape(1, OUT_PAD)

    itemsize = jnp.dtype(x2.dtype).itemsize
    cost = pl.CostEstimate(
        flops=2 * m_pad * (IN_SIZE * INTER1 + INTER1 * OUT_PAD),
        transcendentals=m_pad * (INTER1 + OUT_PAD),
        bytes_accessed=(m_pad * (IN_SIZE + OUT_PAD) * itemsize
                        + 4 * (IN_SIZE * INTER1 + INTER1 * OUT_PAD
                               + INTER1 + OUT_PAD)),
    )

    out = pl.pallas_call(
        _encoder_kernel,
        out_shape=jax.ShapeDtypeStruct((m_pad, OUT_PAD), x2.dtype),
        grid_spec=pltpu.PrefetchScalarGridSpec(
            num_scalar_prefetch=0,
            grid=(grid_m,),
            in_specs=[
                pl.BlockSpec((tm_eff, IN_SIZE), lambda i: (i, 0)),
                pl.BlockSpec((IN_SIZE, INTER1), lambda i: (0, 0)),
                pl.BlockSpec((1, INTER1), lambda i: (0, 0)),
                pl.BlockSpec((INTER1, OUT_PAD), lambda i: (0, 0)),
                pl.BlockSpec((1, OUT_PAD), lambda i: (0, 0)),
            ],
            out_specs=pl.BlockSpec((tm_eff, OUT_PAD), lambda i: (i, 0)),
        ),
        compiler_params=pltpu.CompilerParams(
            dimension_semantics=("parallel",)),
        cost_estimate=cost,
    )(x2, w1, b1r, w2p, b2p)

    return out[:m, :OUT_SIZE]


if __name__ == "__main__":
    key = jax.random.PRNGKey(0)
    k_x, k_w1, k_b1, k_w2, k_b2 = jax.random.split(key, 5)

    # Small input consistent with forward(): leading dims flatten to rows of 128.
    x = jax.random.normal(k_x, (2, 8, IN_SIZE), dtype=jnp.float32)

    # "Linear" parameters (PyTorch W is (out,in); stored pre-transposed (in,out)).
    w1 = jax.random.normal(k_w1, (IN_SIZE, INTER1), dtype=jnp.float32) * 0.05
    b1 = jax.random.normal(k_b1, (INTER1,), dtype=jnp.float32) * 0.05
    w2 = jax.random.normal(k_w2, (INTER1, OUT_SIZE), dtype=jnp.float32) * 0.05
    b2 = jax.random.normal(k_b2, (OUT_SIZE,), dtype=jnp.float32) * 0.05

    ref_full = jax.nn.sigmoid(
        jax.nn.sigmoid(x.reshape(-1, IN_SIZE) @ w1 + b1) @ w2 + b2)

    # 1) Default large-tile path (grid collapses to 1 step at this tiny size).
    out = jax.block_until_ready(encoder_forward(x, w1, b1, w2, b2))
    assert out.shape == (16, OUT_SIZE)
    assert jnp.allclose(out, ref_full, atol=1e-5, rtol=1e-5)

    # 2) Multi-step grid path (tm=8 -> 2 grid steps) to exercise the index_map.
    out2 = jax.block_until_ready(encoder_forward(x, w1, b1, w2, b2, tm=8))
    assert jnp.allclose(out2, ref_full, atol=1e-5, rtol=1e-5)

    # 3) Ragged row count (m=5, not a multiple of the tile) via padding path.
    x_r = jax.random.normal(key, (5, IN_SIZE), dtype=jnp.float32)
    out3 = jax.block_until_ready(encoder_forward(x_r, w1, b1, w2, b2))
    ref3 = jax.nn.sigmoid(jax.nn.sigmoid(x_r @ w1 + b1) @ w2 + b2)
    assert out3.shape == (5, OUT_SIZE)
    assert jnp.allclose(out3, ref3, atol=1e-5, rtol=1e-5)

    # TODO(synk): Encoder.add_data / data_generator (nn.Embedding, SchNetPack
    # SymmetryFunctions, random triplet sampling) are not part of forward()
    # and are not implemented here.
    print("KERNEL_OK")
</pallas_src>

<mosaic_0001>
module attributes {stable_mosaic.version = 11 : i64} {
  func.func @_encoder_kernel(%arg0: i32, %arg1: memref<16x128xf32, #tpu.memory_space<vmem>>, %arg2: memref<128x96xf32, #tpu.memory_space<vmem>>, %arg3: memref<1x96xf32, #tpu.memory_space<vmem>>, %arg4: memref<96x128xf32, #tpu.memory_space<vmem>>, %arg5: memref<1x128xf32, #tpu.memory_space<vmem>>, %arg6: memref<16x128xf32, #tpu.memory_space<vmem>>) attributes {dimension_semantics = [#tpu.dimension_semantics<parallel>], iteration_bounds = array<i64: 1>, scalar_prefetch = 0 : i64, scratch_operands = 0 : i64, tpu.core_type = #tpu.core_type<tc>, window_params = [{transform_indices = @transform_0, window_bounds = array<i64: 16, 128>}, {pipeline_mode = #tpu.pipeline_mode<synchronous>, transform_indices = @transform_1, window_bounds = array<i64: 128, 96>}, {pipeline_mode = #tpu.pipeline_mode<synchronous>, transform_indices = @transform_2, window_bounds = array<i64: 1, 96>}, {pipeline_mode = #tpu.pipeline_mode<synchronous>, transform_indices = @transform_3, window_bounds = array<i64: 96, 128>}, {pipeline_mode = #tpu.pipeline_mode<synchronous>, transform_indices = @transform_4, window_bounds = array<i64: 1, 128>}, {transform_indices = @transform_5, window_bounds = array<i64: 16, 128>}]} {
    %c0 = arith.constant 0 : index
    %c0_0 = arith.constant 0 : index
    %0 = vector.load %arg1[%c0, %c0_0] : memref<16x128xf32, #tpu.memory_space<vmem>>, vector<16x128xf32>
    %c0_1 = arith.constant 0 : index
    %c0_2 = arith.constant 0 : index
    %1 = vector.load %arg2[%c0_1, %c0_2] : memref<128x96xf32, #tpu.memory_space<vmem>>, vector<128x96xf32>
    %cst = arith.constant dense<0.000000e+00> : vector<16x96xf32>
    %2 = tpu.matmul %0, %1, %cst {dimension_numbers = #tpu.dot_dimension_numbers<[1], [0], [0], [1], [0, 0, 1, 1], [], []>} : vector<16x128xf32>, vector<128x96xf32>, vector<16x96xf32> -> vector<16x96xf32>
    %c0_3 = arith.constant 0 : index
    %c0_4 = arith.constant 0 : index
    %3 = vector.load %arg3[%c0_3, %c0_4] : memref<1x96xf32, #tpu.memory_space<vmem>>, vector<1x96xf32>
    %4 = vector.broadcast %3 : vector<1x96xf32> to vector<16x96xf32>
    %5 = arith.addf %2, %4 : vector<16x96xf32>
    %6 = arith.negf %5 : vector<16x96xf32>
    %7 = math.exp %6 : vector<16x96xf32>
    %cst_5 = arith.constant 1.000000e+00 : f32
    %8 = vector.broadcast %cst_5 : f32 to vector<16x96xf32>
    %9 = arith.addf %8, %7 : vector<16x96xf32>
    %10 = arith.divf %8, %9 : vector<16x96xf32>
    %c0_6 = arith.constant 0 : index
    %c0_7 = arith.constant 0 : index
    %11 = vector.load %arg4[%c0_6, %c0_7] : memref<96x128xf32, #tpu.memory_space<vmem>>, vector<96x128xf32>
    %cst_8 = arith.constant dense<0.000000e+00> : vector<16x128xf32>
    %12 = tpu.matmul %10, %11, %cst_8 {dimension_numbers = #tpu.dot_dimension_numbers<[1], [0], [0], [1], [0, 0, 1, 1], [], []>} : vector<16x96xf32>, vector<96x128xf32>, vector<16x128xf32> -> vector<16x128xf32>
    %c0_9 = arith.constant 0 : index
    %c0_10 = arith.constant 0 : index
    %13 = vector.load %arg5[%c0_9, %c0_10] : memref<1x128xf32, #tpu.memory_space<vmem>>, vector<1x128xf32>
    %14 = vector.broadcast %13 : vector<1x128xf32> to vector<16x128xf32>
    %15 = arith.addf %12, %14 : vector<16x128xf32>
    %16 = arith.negf %15 : vector<16x128xf32>
    %17 = math.exp %16 : vector<16x128xf32>
    %cst_11 = arith.constant 1.000000e+00 : f32
    %18 = vector.broadcast %cst_11 : f32 to vector<16x128xf32>
    %19 = arith.addf %18, %17 : vector<16x128xf32>
    %20 = arith.divf %18, %19 : vector<16x128xf32>
    %c0_12 = arith.constant 0 : index
    %c0_13 = arith.constant 0 : index
    %21 = vector.load %arg6[%c0_12, %c0_13] : memref<16x128xf32, #tpu.memory_space<vmem>>, vector<16x128xf32>
    tpu.vector_store %arg6[%c0_12, %c0_13], %20 {strides = array<i32>} : memref<16x128xf32, #tpu.memory_space<vmem>>, vector<16x128xf32>,
    return
  }
  func.func @transform_0(%arg0: i32) -> (i32, i32) {
    %c0_i32 = arith.constant 0 : i32
    %c0_i32_0 = arith.constant 0 : i32
    return %arg0, %c0_i32 : i32, i32
  }
  func.func @transform_1(%arg0: i32) -> (i32, i32) {
    %c0_i32 = arith.constant 0 : i32
    %c0_i32_0 = arith.constant 0 : i32
    %c0_i32_1 = arith.constant 0 : i32
    return %c0_i32, %c0_i32_0 : i32, i32
  }
  func.func @transform_2(%arg0: i32) -> (i32, i32) {
    %c0_i32 = arith.constant 0 : i32
    %c0_i32_0 = arith.constant 0 : i32
    %c0_i32_1 = arith.constant 0 : i32
    return %c0_i32, %c0_i32_0 : i32, i32
  }
  func.func @transform_3(%arg0: i32) -> (i32, i32) {
    %c0_i32 = arith.constant 0 : i32
    %c0_i32_0 = arith.constant 0 : i32
    %c0_i32_1 = arith.constant 0 : i32
    return %c0_i32, %c0_i32_0 : i32, i32
  }
  func.func @transform_4(%arg0: i32) -> (i32, i32) {
    %c0_i32 = arith.constant 0 : i32
    %c0_i32_0 = arith.constant 0 : i32
    %c0_i32_1 = arith.constant 0 : i32
    return %c0_i32, %c0_i32_0 : i32, i32
  }
  func.func @transform_5(%arg0: i32) -> (i32, i32) {
    %c0_i32 = arith.constant 0 : i32
    %c0_i32_0 = arith.constant 0 : i32
    return %arg0, %c0_i32 : i32, i32
  }
}

</mosaic_0001>

<bundles_post_ra>
// kernel: tpu_custom_call.1
= control target key start
LH: loop header
LB: loop body
LE: loop exit
PB: predicated region body
PF: predicated region fallthrough
CT: control target
= control target key end

     0   :  { %s539_s0 = inlined_call_operand.vmem [shape: f32[16,128], index: 0, kind: input, shape index: {}]   ;;  %s540_s1 = inlined_call_operand.vmem [shape: f32[128,96], index: 1, kind: input, shape index: {}]   ;;  %s541_s2 = inlined_call_operand.vmem [shape: f32[1,96], index: 2, kind: input, shape index: {}]   ;;  %s542_s3 = inlined_call_operand.vmem [shape: f32[96,128], index: 3, kind: input, shape index: {}]   ;;  %s543_s4 = inlined_call_operand.vmem [shape: f32[1,128], index: 4, kind: input, shape index: {}]   ;;  %s544_s5 = inlined_call_operand.hbm [shape: f32[16,128], index: 5, kind: output, shape index: {}]  }
   0x1   :  { %v38_v0 = vld [vmem:[%s540_s1 + $0x78] sm:$0xff]  ;;  %v37_v1 = vld [vmem:[%s540_s1 + $0x70] sm:$0xff]  ;;  %v36_v2 = vld [vmem:[%s540_s1 + $0x68] sm:$0xff] }
   0x2   :  { %304 = vmatprep.subr.mxu0 %v38_v0  ;;  %v35_v3 = vld [vmem:[%s540_s1 + $0x60] sm:$0xff]  ;;  %v34_v5 = vld [vmem:[%s540_s1 + $0x58] sm:$0xff] }
   0x3   :  { %305 = vmatpush3.msra.mxu0 %v38_v0  ;;  %v21_v4 = vld [vmem:[%s539_s0] sm:$0xff] }
   0x4   :  { %306 = vmatprep.subr.mxu0 %v37_v1  ;;  %336 = vmatprep.mubr.f32.mxu0 %v21_v4 }
   0x5   :  { %307 = vmatpush3.msra.mxu0 %v37_v1 }
   0x6   :  { %308 = vmatprep.subr.mxu0 %v36_v2 }
   0x7   :  { %309 = vmatpush3.msra.mxu0 %v36_v2 }
   0x8   :  { %10 = vsyncpa [#allocation3], 0  ;;  %310 = vmatprep.subr.mxu0 %v35_v3  ;;  %v33_v6 = vld [vmem:[%s540_s1 + $0x50] sm:$0xff]  ;;  %v32_v7 = vld [vmem:[%s540_s1 + $0x48] sm:$0xff]  ;;  %vm152_vm0 = vcmask 785408   ;;  %s407_s28 = smov [#allocation2]  }
   0x9   :  { %311 = vmatpush3.msra.mxu0 %v35_v3  ;;  %v31_v8 = vld [vmem:[%s540_s1 + $0x40] sm:$0xff]  ;;  %v30_v9 = vld [vmem:[%s540_s1 + $0x38] sm:$0xff]  ;;  %v29_v10 = vld [vmem:[%s540_s1 + $0x30] sm:$0xff]  ;;  %s253_s29 = sshll.u32 %s407_s28, 4  ;;  %s254_s29 = int_to_ptr.vmem [resolvable:$true] %s253_s29 }
   0xa   :  { %312 = vmatprep.subr.mxu0 %v34_v5  ;;  %v28_v11 = vld [vmem:[%s540_s1 + $0x28] sm:$0xff]  ;;  %v27_v12 = vld [vmem:[%s540_s1 + $0x20] sm:$0xff]  ;;  %v26_v13 = vld [vmem:[%s540_s1 + $0x18] sm:$0xff]  ;;  %p390_p1 = scmp.lt.s32.totalorder %s254_s29, %s254_s29 }
   0xb   :  { %313 = vmatpush3.msra.mxu0 %v34_v5  ;;  %v25_v14 = vld [vmem:[%s540_s1 + $0x10] sm:$0xff]  ;;  %v24_v15 = vld [vmem:[%s540_s1 + $0x8] sm:$0xff]  ;;  %v23_v16 = vld [vmem:[%s540_s1] sm:$0xff] }
   0xc   :  { %314 = vmatprep.subr.mxu0 %v33_v6  ;;  %v22_v17 = vld [vmem:[%s539_s0 + $0x8] sm:$0xff]  ;;  %v144_v18 = vld [vmem:[%s542_s3 + $0x58] sm:$0xff]  ;;  %v143_v19 = vld [vmem:[%s542_s3 + $0x50] sm:$0xff] }
   0xd   :  { %315 = vmatpush3.msra.mxu0 %v33_v6  ;;  %339 = vmatprep.subr.mxu1 %v144_v18  ;;  %v142_v20 = vld [vmem:[%s542_s3 + $0x48] sm:$0xff]  ;;  %v141_v21 = vld [vmem:[%s542_s3 + $0x40] sm:$0xff]  ;;  %v140_v22 = vld [vmem:[%s542_s3 + $0x38] sm:$0xff] }
   0xe   :  { %316 = vmatprep.subr.mxu0 %v32_v7  ;;  %340 = vmatpush3.msra.mxu1 %v144_v18  ;;  %v139_v23 = vld [vmem:[%s542_s3 + $0x30] sm:$0xff]  ;;  %v138_v24 = vld [vmem:[%s542_s3 + $0x28] sm:$0xff]  ;;  %v137_v25 = vld [vmem:[%s542_s3 + $0x20] sm:$0xff] }
   0xf   :  { %317 = vmatpush3.msra.mxu0 %v32_v7  ;;  %341 = vmatprep.subr.mxu1 %v143_v19  ;;  %v136_v26 = vld [vmem:[%s542_s3 + $0x18] sm:$0xff]  ;;  %v135_v27 = vld [vmem:[%s542_s3 + $0x10] sm:$0xff]  ;;  %v134_v28 = vld [vmem:[%s542_s3 + $0x8] sm:$0xff] }
  0x10   :  { %318 = vmatprep.subr.mxu0 %v31_v8  ;;  %342 = vmatpush3.msra.mxu1 %v143_v19  ;;  %v133_v29 = vld [vmem:[%s542_s3] sm:$0xff] }
  0x11   :  { %319 = vmatpush3.msra.mxu0 %v31_v8  ;;  %343 = vmatprep.subr.mxu1 %v142_v20  ;;  %v264_v30 = vld [vmem:[%s541_s2] ss:$0 sm:$0xff] }
  0x12   :  { %320 = vmatprep.subr.mxu0 %v30_v9  ;;  %344 = vmatpush3.msra.mxu1 %v142_v20  ;;  %v267_v43 = vld [vmem:[%s543_s4] ss:$0 sm:$0xff]  ;;  %s385_s4 = scalar_lea.vmem %s254_s29, 256 }
  0x13   :  { %321 = vmatpush3.msra.mxu0 %v30_v9  ;;  %345 = vmatprep.subr.mxu1 %v141_v21  ;;  %p386_p0 = scmp.ne.s32.totalorder %s254_s29, %s385_s4  ;;  %p391_p2 = scmp.lt.s32.totalorder %s385_s4, %s385_s4 }
  0x14   :  { %322 = vmatprep.subr.mxu0 %v29_v10  ;;  %346 = vmatpush3.msra.mxu1 %v141_v21 }
  0x15   :  { %323 = vmatpush3.msra.mxu0 %v29_v10  ;;  %347 = vmatprep.subr.mxu1 %v140_v22  ;;  %p392_p3 = por %p391_p2, %p390_p1 }
  0x16   :  { %324 = vmatprep.subr.mxu0 %v28_v11  ;;  %348 = vmatpush3.msra.mxu1 %v140_v22 }
  0x17   :  { %325 = vmatpush3.msra.mxu0 %v28_v11  ;;  %349 = vmatprep.subr.mxu1 %v139_v23  ;;  %p393_p4 = pnand %p392_p3, %p386_p0 }
  0x18   :  { %326 = vmatprep.subr.mxu0 %v27_v12  ;;  %350 = vmatpush3.msra.mxu1 %v139_v23 }
  0x19   :  { %327 = vmatpush3.msra.mxu0 %v27_v12  ;;  %351 = vmatprep.subr.mxu1 %v138_v24 }
  0x1a   :  { %328 = vmatprep.subr.mxu0 %v26_v13  ;;  %352 = vmatpush3.msra.mxu1 %v138_v24 }
  0x1b   :  { %329 = vmatpush3.msra.mxu0 %v26_v13  ;;  %353 = vmatprep.subr.mxu1 %v137_v25 }
  0x1c   :  { %330 = vmatprep.subr.mxu0 %v25_v14  ;;  %354 = vmatpush3.msra.mxu1 %v137_v25 }
  0x1d   :  { %331 = vmatpush3.msra.mxu0 %v25_v14  ;;  %355 = vmatprep.subr.mxu1 %v136_v26 }
  0x1e   :  { %332 = vmatprep.subr.mxu0 %v24_v15  ;;  %356 = vmatpush3.msra.mxu1 %v136_v26 }
  0x1f   :  { %333 = vmatpush3.msra.mxu0 %v24_v15  ;;  %357 = vmatprep.subr.mxu1 %v135_v27 }
  0x20   :  { %334 = vmatprep.subr.mxu0 %v23_v16  ;;  %358 = vmatpush3.msra.mxu1 %v135_v27 }
  0x21   :  { %335 = vmatpush3.msra.mxu0 %v23_v16  ;;  %359 = vmatprep.subr.mxu1 %v134_v28 }
  0x22   :  { %337 = vmatmul.mubr.f32.vlgmr.msra.gmra.mxu0 %v22_v17  ;;  %360 = vmatpush3.msra.mxu1 %v134_v28 }
  0x23   :  { %361 = vmatprep.subr.mxu1 %v133_v29 }
  0x24   :  { %362 = vmatpush3.msra.mxu1 %v133_v29 }
  0xe2   :  { %v338_v31 = vpop.f32.mrf.mxu0 }
  0xe3   :  { %v118_v32 = vadd.f32 %v338_v31, %v264_v30 }
  0xe4   :  { %v112_v33 = vpop.f32.mrf.mxu0 }
  0xe5   :  { %v266_v34 = vmul.f32 -1.442695, %v118_v32  ;;  %v113_v35 = vadd.f32 %v264_v30, %v112_v33 }
  0xe7   :  { %369 = vpow2.f32 %v266_v34  ;;  %v265_v36 = vmul.f32 -1.442695, %v113_v35 }
  0xe9   :  { %371 = vpow2.f32 %v265_v36 }
  0xf4   :  { %v370_v37 = vpop.eup %369 }
  0xf5   :  { %v128_v39 = vadd.f32 1.0, %v370_v37 }
  0xf6   :  { %v372_v38 = vpop.eup %371 }
  0xf7   :  { %v127_v40 = vadd.f32 1.0, %v372_v38 }
  0xf9   :  { %373 = vrcp.f32 %v127_v40 }
  0xfa   :  { %375 = vrcp.f32 %v128_v39 }
 0x106   :  { %v374_v41 = vpop.eup %373 }
 0x107   :  { %v376_v42 = vpop.eup %375  ;;  %363 = vmatprep.mubr.msk.f32.mxu1 %vm152_vm0, %v374_v41 }
 0x108   :  { %364 = vmatmul.mubr.msk.f32.vlgmr.msra.gmra.mxu1 %vm152_vm0, %v376_v42 }
 0x1c8   :  { %v365_v44 = vpop.f32.mrf.mxu1 }
 0x1c9   :  { %v231_v45 = vadd.f32 %v365_v44, %v267_v43 }
 0x1ca   :  { %v225_v46 = vpop.f32.mrf.mxu1 }
 0x1cb   :  { %v271_v47 = vmul.f32 -1.442695, %v231_v45  ;;  %v226_v48 = vadd.f32 %v267_v43, %v225_v46 }
 0x1cd   :  { %377 = vpow2.f32 %v271_v47  ;;  %v270_v49 = vmul.f32 -1.442695, %v226_v48 }
 0x1cf   :  { %379 = vpow2.f32 %v270_v49 }
 0x1da   :  { %v378_v50 = vpop.eup %377 }
 0x1db   :  { %v241_v51 = vadd.f32 1.0, %v378_v50 }
 0x1dc   :  { %v380_v52 = vpop.eup %379 }
 0x1dd   :  { %381 = vrcp.f32 %v241_v51  ;;  %v240_v53 = vadd.f32 1.0, %v380_v52 }
 0x1df   :  { %383 = vrcp.f32 %v240_v53 }
 0x1ea   :  { %v382_v54 = vpop.eup %381 }
 0x1eb   :  { %247 = vst [vmem:[#allocation2 + $0x8] sm:$0xff] %v382_v54 }
 0x1ec   :  { %v384_v55 = vpop.eup %383 }
 0x1ed   :  { %246 = vst [vmem:[#allocation2] sm:$0xff] %v384_v55 }
 0x1ee   :  { %396 = shalt.err (!%p393_p4)
}
 0x1ef   :  { %s408_s30 = smov 128   ;;  %s409_s6 = smov 8  }
 0x1f0   :  { %259 = dma.vmem_to_hbm [thread:$0]  %s254_s29, 256, %s544_s5, [#allocation3], %s408_s30, %s408_s30, %s409_s6  }
 0x1f1   :  { %405 = dma.done.wait [#allocation3], 256  }
 0x1f2   :  { %406 = vsyncadd [#allocation3], 4294967040 }
 0x1f3   :  { %263 = vsyncpa [#allocation3], 1 }

</bundles_post_ra>
